<compile_context>
chip_gen: v6e
topology: v6e:2x2x1
jax: 0.10.0
libtpu: 0.0.40
codegen_flags: <defaults>
</compile_context>

<pallas_src>
import math

import jax
import jax.numpy as jnp
from jax.experimental import pallas as pl
from jax.experimental.pallas import tpu as pltpu


def _gelu_tanh(x):
    # GELU with tanh approximation (matches torch.nn.GELU(approximate='tanh')).
    c = math.sqrt(2.0 / math.pi)
    return 0.5 * x * (1.0 + jnp.tanh(c * (x + 0.044715 * x * x * x)))


def mlp_kernel(x_ref, w1_ref, b1_ref, w2_ref, b2_ref, o_ref):
    # x_ref:  (TM, C)   row tile of flattened tokens
    # w1_ref: (C, 4C)   c_fc weight (transposed vs torch), VMEM-resident
    # b1_ref: (1, 4C)   c_fc bias
    # w2_ref: (4C, C)   c_proj weight (transposed vs torch), VMEM-resident
    # b2_ref: (1, C)    c_proj bias
    # o_ref:  (TM, C)   output row tile
    x = x_ref[...]                                  # native dtype -> MXU
    h = jnp.dot(x, w1_ref[...], preferred_element_type=jnp.float32)
    h = _gelu_tanh(h + b1_ref[...].astype(jnp.float32))   # f32 elementwise
    h = h.astype(w2_ref.dtype)                      # back to operand dtype
    out = jnp.dot(h, w2_ref[...], preferred_element_type=jnp.float32)
    out = out + b2_ref[...].astype(jnp.float32)
    o_ref[...] = out.astype(o_ref.dtype)


def _round_up(a, b):
    return ((a + b - 1) // b) * b


def mlp_forward(x, w1, b1, w2, b2, *, tm=256):
    """x: (B, T, C). w1: (C, 4C), b1: (1, 4C), w2: (4C, C), b2: (1, C).

    For best throughput on real GPT-2 shapes, pass bf16 x / w1 / w2 (cast once
    on the host side); accumulation inside the kernel is always f32.
    Returns (B, T, C) in x.dtype.
    """
    B, T, C = x.shape
    H = w1.shape[1]                      # 4 * C
    M = B * T

    # Row-tile size: multiple of 8 (sublane), capped at `tm` (MXU-friendly 256).
    TM = min(tm, _round_up(M, 8))
    Mp = _round_up(M, TM)

    x2d = x.reshape(M, C)
    if Mp != M:
        x2d = jnp.pad(x2d, ((0, Mp - M), (0, 0)))

    itemsize = jnp.dtype(x.dtype).itemsize
    cost = pl.CostEstimate(
        flops=4 * M * C * H,                       # two (M,C)x(C,H)-class matmuls
        transcendentals=M * H,                     # tanh in GELU
        bytes_accessed=(x2d.nbytes + w1.nbytes + b1.nbytes
                        + w2.nbytes + b2.nbytes + M * C * itemsize),
    )

    # VMEM budget: resident weights + double-buffered x/out tiles + f32 h tile.
    est_vmem = (w1.nbytes + b1.nbytes + w2.nbytes + b2.nbytes
                + 2 * 2 * TM * C * itemsize        # x + out, double-buffered
                + TM * H * 4)                      # f32 intermediate
    vmem_limit = int(min(max(2 * est_vmem, 32 * 1024 * 1024),
                         64 * 1024 * 1024))        # within v7x physical VMEM

    grid = (Mp // TM,)

    out2d = pl.pallas_call(
        mlp_kernel,
        out_shape=jax.ShapeDtypeStruct((Mp, C), x.dtype),
        grid_spec=pltpu.PrefetchScalarGridSpec(
            num_scalar_prefetch=0,
            grid=grid,
            in_specs=[
                pl.BlockSpec((TM, C), lambda i: (i, 0)),   # x: tiled over rows
                pl.BlockSpec((C, H), lambda i: (0, 0)),    # w1: VMEM-resident
                pl.BlockSpec((1, H), lambda i: (0, 0)),    # b1: VMEM-resident
                pl.BlockSpec((H, C), lambda i: (0, 0)),    # w2: VMEM-resident
                pl.BlockSpec((1, C), lambda i: (0, 0)),    # b2: VMEM-resident
            ],
            out_specs=pl.BlockSpec((TM, C), lambda i: (i, 0)),
        ),
        compiler_params=pltpu.CompilerParams(
            dimension_semantics=("parallel",),     # row tiles independent
            vmem_limit_bytes=vmem_limit,
        ),
        cost_estimate=cost,
    )(x2d, w1, b1, w2, b2)

    if Mp != M:
        out2d = out2d[:M]
    return out2d.reshape(B, T, C)
    # TODO(synk): for very large hidden sizes on v7x (64 MiB VMEM), add an H
    # grid axis (tile w1 columns / w2 rows) with an f32 VMEM accumulator.


if __name__ == "__main__":
    # Small GPT-2-style config: batch=2, seq=8, n_embd=32 -> hidden=128.
    B, T, n_embd = 2, 8, 32
    hidden = 4 * n_embd

    key = jax.random.PRNGKey(0)
    kx, kw1, kb1, kw2, kb2 = jax.random.split(key, 5)

    x = jax.random.normal(kx, (B, T, n_embd), dtype=jnp.float32)

    # Deterministic init mimicking nn.Linear default (uniform +- 1/sqrt(fan_in)).
    # Weights stored as (in, out), i.e. transposed vs torch's (out, in).
    bound1 = 1.0 / math.sqrt(n_embd)
    w1 = jax.random.uniform(kw1, (n_embd, hidden), jnp.float32, -bound1, bound1)
    b1 = jax.random.uniform(kb1, (1, hidden), jnp.float32, -bound1, bound1)
    bound2 = 1.0 / math.sqrt(hidden)
    w2 = jax.random.uniform(kw2, (hidden, n_embd), jnp.float32, -bound2, bound2)
    b2 = jax.random.uniform(kb2, (1, n_embd), jnp.float32, -bound2, bound2)

    out = mlp_forward(x, w1, b1, w2, b2)
    jax.block_until_ready(out)

    # Reference check in plain JAX.
    ref = _gelu_tanh(x.reshape(-1, n_embd) @ w1 + b1) @ w2 + b2
    ref = ref.reshape(B, T, n_embd)
    assert out.shape == (B, T, n_embd)
    assert jnp.allclose(out, ref, atol=1e-4, rtol=1e-4), (
        float(jnp.max(jnp.abs(out - ref))))

    print("KERNEL_OK")
</pallas_src>

<mosaic_0001>
module attributes {stable_mosaic.version = 11 : i64} {
  func.func @mlp_kernel(%arg0: i32, %arg1: memref<16x32xf32, #tpu.memory_space<vmem>>, %arg2: memref<32x128xf32, #tpu.memory_space<vmem>>, %arg3: memref<1x128xf32, #tpu.memory_space<vmem>>, %arg4: memref<128x32xf32, #tpu.memory_space<vmem>>, %arg5: memref<1x32xf32, #tpu.memory_space<vmem>>, %arg6: memref<16x32xf32, #tpu.memory_space<vmem>>) attributes {dimension_semantics = [#tpu.dimension_semantics<parallel>], iteration_bounds = array<i64: 1>, scalar_prefetch = 0 : i64, scratch_operands = 0 : i64, tpu.core_type = #tpu.core_type<tc>, window_params = [{transform_indices = @transform_0, window_bounds = array<i64: 16, 32>}, {pipeline_mode = #tpu.pipeline_mode<synchronous>, transform_indices = @transform_1, window_bounds = array<i64: 32, 128>}, {pipeline_mode = #tpu.pipeline_mode<synchronous>, transform_indices = @transform_2, window_bounds = array<i64: 1, 128>}, {pipeline_mode = #tpu.pipeline_mode<synchronous>, transform_indices = @transform_3, window_bounds = array<i64: 128, 32>}, {pipeline_mode = #tpu.pipeline_mode<synchronous>, transform_indices = @transform_4, window_bounds = array<i64: 1, 32>}, {transform_indices = @transform_5, window_bounds = array<i64: 16, 32>}]} {
    %c0 = arith.constant 0 : index
    %c0_0 = arith.constant 0 : index
    %0 = vector.load %arg1[%c0, %c0_0] : memref<16x32xf32, #tpu.memory_space<vmem>>, vector<16x32xf32>
    %c0_1 = arith.constant 0 : index
    %c0_2 = arith.constant 0 : index
    %1 = vector.load %arg2[%c0_1, %c0_2] : memref<32x128xf32, #tpu.memory_space<vmem>>, vector<32x128xf32>
    %cst = arith.constant dense<0.000000e+00> : vector<16x128xf32>
    %2 = tpu.matmul %0, %1, %cst {dimension_numbers = #tpu.dot_dimension_numbers<[1], [0], [0], [1], [0, 0, 1, 1], [], []>} : vector<16x32xf32>, vector<32x128xf32>, vector<16x128xf32> -> vector<16x128xf32>
    %c0_3 = arith.constant 0 : index
    %c0_4 = arith.constant 0 : index
    %3 = vector.load %arg3[%c0_3, %c0_4] : memref<1x128xf32, #tpu.memory_space<vmem>>, vector<1x128xf32>
    %4 = vector.broadcast %3 : vector<1x128xf32> to vector<16x128xf32>
    %5 = arith.addf %2, %4 : vector<16x128xf32>
    %cst_5 = arith.constant 5.000000e-01 : f32
    %6 = vector.broadcast %cst_5 : f32 to vector<16x128xf32>
    %7 = arith.mulf %6, %5 : vector<16x128xf32>
    %cst_6 = arith.constant 4.471500e-02 : f32
    %8 = vector.broadcast %cst_6 : f32 to vector<16x128xf32>
    %9 = arith.mulf %8, %5 : vector<16x128xf32>
    %10 = arith.mulf %9, %5 : vector<16x128xf32>
    %11 = arith.mulf %10, %5 : vector<16x128xf32>
    %12 = arith.addf %5, %11 : vector<16x128xf32>
    %cst_7 = arith.constant 0.797884583 : f32
    %13 = vector.broadcast %cst_7 : f32 to vector<16x128xf32>
    %14 = arith.mulf %13, %12 : vector<16x128xf32>
    %15 = math.tanh %14 : vector<16x128xf32>
    %cst_8 = arith.constant 1.000000e+00 : f32
    %16 = vector.broadcast %cst_8 : f32 to vector<16x128xf32>
    %17 = arith.addf %16, %15 : vector<16x128xf32>
    %18 = arith.mulf %7, %17 : vector<16x128xf32>
    %c0_9 = arith.constant 0 : index
    %c0_10 = arith.constant 0 : index
    %19 = vector.load %arg4[%c0_9, %c0_10] : memref<128x32xf32, #tpu.memory_space<vmem>>, vector<128x32xf32>
    %cst_11 = arith.constant dense<0.000000e+00> : vector<16x32xf32>
    %20 = tpu.matmul %18, %19, %cst_11 {dimension_numbers = #tpu.dot_dimension_numbers<[1], [0], [0], [1], [0, 0, 1, 1], [], []>} : vector<16x128xf32>, vector<128x32xf32>, vector<16x32xf32> -> vector<16x32xf32>
    %c0_12 = arith.constant 0 : index
    %c0_13 = arith.constant 0 : index
    %21 = vector.load %arg5[%c0_12, %c0_13] : memref<1x32xf32, #tpu.memory_space<vmem>>, vector<1x32xf32>
    %22 = vector.broadcast %21 : vector<1x32xf32> to vector<16x32xf32>
    %23 = arith.addf %20, %22 : vector<16x32xf32>
    %c0_14 = arith.constant 0 : index
    %c0_15 = arith.constant 0 : index
    %24 = vector.load %arg6[%c0_14, %c0_15] : memref<16x32xf32, #tpu.memory_space<vmem>>, vector<16x32xf32>
    tpu.vector_store %arg6[%c0_14, %c0_15], %23 {strides = array<i32>} : memref<16x32xf32, #tpu.memory_space<vmem>>, vector<16x32xf32>,
    return
  }
  func.func @transform_0(%arg0: i32) -> (i32, i32) {
    %c0_i32 = arith.constant 0 : i32
    %c0_i32_0 = arith.constant 0 : i32
    return %arg0, %c0_i32 : i32, i32
  }
  func.func @transform_1(%arg0: i32) -> (i32, i32) {
    %c0_i32 = arith.constant 0 : i32
    %c0_i32_0 = arith.constant 0 : i32
    %c0_i32_1 = arith.constant 0 : i32
    return %c0_i32, %c0_i32_0 : i32, i32
  }
  func.func @transform_2(%arg0: i32) -> (i32, i32) {
    %c0_i32 = arith.constant 0 : i32
    %c0_i32_0 = arith.constant 0 : i32
    %c0_i32_1 = arith.constant 0 : i32
    return %c0_i32, %c0_i32_0 : i32, i32
  }
  func.func @transform_3(%arg0: i32) -> (i32, i32) {
    %c0_i32 = arith.constant 0 : i32
    %c0_i32_0 = arith.constant 0 : i32
    %c0_i32_1 = arith.constant 0 : i32
    return %c0_i32, %c0_i32_0 : i32, i32
  }
  func.func @transform_4(%arg0: i32) -> (i32, i32) {
    %c0_i32 = arith.constant 0 : i32
    %c0_i32_0 = arith.constant 0 : i32
    %c0_i32_1 = arith.constant 0 : i32
    return %c0_i32, %c0_i32_0 : i32, i32
  }
  func.func @transform_5(%arg0: i32) -> (i32, i32) {
    %c0_i32 = arith.constant 0 : i32
    %c0_i32_0 = arith.constant 0 : i32
    return %arg0, %c0_i32 : i32, i32
  }
}

</mosaic_0001>

<bundles_post_ra>
// kernel: tpu_custom_call.1
= control target key start
LH: loop header
LB: loop body
LE: loop exit
PB: predicated region body
PF: predicated region fallthrough
CT: control target
= control target key end

     0   :  { %vm34_vm0 = vcmask 261120   ;;  %s465_s0 = inlined_call_operand.vmem [shape: f32[16,32], index: 0, kind: input, shape index: {}]   ;;  %s466_s1 = inlined_call_operand.vmem [shape: f32[32,128], index: 1, kind: input, shape index: {}]   ;;  %s467_s2 = inlined_call_operand.vmem [shape: f32[1,128], index: 2, kind: input, shape index: {}]   ;;  %s468_s3 = inlined_call_operand.vmem [shape: f32[128,32], index: 3, kind: input, shape index: {}]   ;;  %s469_s4 = inlined_call_operand.vmem [shape: f32[1,32], index: 4, kind: input, shape index: {}]   ;;  %s470_s5 = inlined_call_operand.hbm [shape: f32[16,32], index: 5, kind: output, shape index: {}]  }
   0x1   :  { %v26_v0 = vld [vmem:[%s466_s1 + $0x18] sm:$0xff]  ;;  %v25_v1 = vld [vmem:[%s466_s1 + $0x10] sm:$0xff]  ;;  %v21_v2 = vld [vmem:[%s465_s0] sm:$0xff] }
   0x2   :  { %278 = vmatprep.subr.mxu0 %v26_v0  ;;  %v24_v3 = vld [vmem:[%s466_s1 + $0x8] sm:$0xff]  ;;  %286 = vmatprep.mubr.msk.f32.mxu0 %vm34_vm0, %v21_v2 }
   0x3   :  { %279 = vmatpush3.msra.mxu0 %v26_v0 }
   0x4   :  { %10 = vsyncpa [#allocation3], 0  ;;  %280 = vmatprep.subr.mxu0 %v25_v1  ;;  %v23_v4 = vld [vmem:[%s466_s1] sm:$0xff]  ;;  %v22_v5 = vld [vmem:[%s465_s0 + $0x8] sm:$0xff]  ;;  %s353_s10 = smov [#allocation2]  }
   0x5   :  { %281 = vmatpush3.msra.mxu0 %v25_v1  ;;  %v149_v6 = vld [vmem:[%s468_s3 + $0x78] sm:$0xff]  ;;  %v148_v7 = vld [vmem:[%s468_s3 + $0x70] sm:$0xff]  ;;  %v147_v8 = vld [vmem:[%s468_s3 + $0x68] sm:$0xff]  ;;  %s239_s11 = sshll.u32 %s353_s10, 4  ;;  %s240_s11 = int_to_ptr.vmem [resolvable:$true] %s239_s11 }
   0x6   :  { %282 = vmatprep.subr.mxu0 %v24_v3  ;;  %289 = vmatprep.subr.mxu1 %v149_v6  ;;  %v146_v9 = vld [vmem:[%s468_s3 + $0x60] sm:$0xff]  ;;  %v145_v10 = vld [vmem:[%s468_s3 + $0x58] sm:$0xff]  ;;  %v144_v11 = vld [vmem:[%s468_s3 + $0x50] sm:$0xff]  ;;  %s331_s12 = scalar_lea.vmem %s240_s11, 256  ;;  %p336_p1 = scmp.lt.s32.totalorder %s240_s11, %s240_s11 }
   0x7   :  { %283 = vmatpush3.msra.mxu0 %v24_v3  ;;  %290 = vmatpush3.msra.mxu1 %v149_v6  ;;  %v143_v12 = vld [vmem:[%s468_s3 + $0x48] sm:$0xff]  ;;  %v142_v13 = vld [vmem:[%s468_s3 + $0x40] sm:$0xff]  ;;  %v141_v14 = vld [vmem:[%s468_s3 + $0x38] sm:$0xff]  ;;  %p332_p0 = scmp.ne.s32.totalorder %s240_s11, %s331_s12  ;;  %p337_p2 = scmp.lt.s32.totalorder %s331_s12, %s331_s12 }
   0x8   :  { %284 = vmatprep.subr.mxu0 %v23_v4  ;;  %291 = vmatprep.subr.mxu1 %v148_v7  ;;  %v140_v15 = vld [vmem:[%s468_s3 + $0x30] sm:$0xff]  ;;  %v139_v16 = vld [vmem:[%s468_s3 + $0x28] sm:$0xff]  ;;  %v138_v17 = vld [vmem:[%s468_s3 + $0x20] sm:$0xff] }
   0x9   :  { %285 = vmatpush3.msra.mxu0 %v23_v4  ;;  %292 = vmatpush3.msra.mxu1 %v148_v7  ;;  %v137_v18 = vld [vmem:[%s468_s3 + $0x18] sm:$0xff]  ;;  %v136_v19 = vld [vmem:[%s468_s3 + $0x10] sm:$0xff]  ;;  %v135_v20 = vld [vmem:[%s468_s3 + $0x8] sm:$0xff]  ;;  %p338_p3 = por %p337_p2, %p336_p1 }
   0xa   :  { %287 = vmatmul.mubr.msk.f32.vlgmr.msra.gmra.mxu0 %vm34_vm0, %v22_v5  ;;  %293 = vmatprep.subr.mxu1 %v147_v8  ;;  %v134_v21 = vld [vmem:[%s468_s3] sm:$0xff] }
   0xb   :  { %294 = vmatpush3.msra.mxu1 %v147_v8  ;;  %v250_v22 = vld [vmem:[%s467_s2] ss:$0 sm:$0xff]  ;;  %p339_p4 = pnand %p338_p3, %p332_p0 }
   0xc   :  { %295 = vmatprep.subr.mxu1 %v146_v9  ;;  %v253_v45 = vld [vmem:[%s469_s4] ss:$0 sm:$0xff] }
   0xd   :  { %296 = vmatpush3.msra.mxu1 %v146_v9 }
   0xe   :  { %297 = vmatprep.subr.mxu1 %v145_v10 }
   0xf   :  { %298 = vmatpush3.msra.mxu1 %v145_v10 }
  0x10   :  { %299 = vmatprep.subr.mxu1 %v144_v11 }
  0x11   :  { %300 = vmatpush3.msra.mxu1 %v144_v11 }
  0x12   :  { %301 = vmatprep.subr.mxu1 %v143_v12 }
  0x13   :  { %302 = vmatpush3.msra.mxu1 %v143_v12 }
  0x14   :  { %303 = vmatprep.subr.mxu1 %v142_v13 }
  0x15   :  { %304 = vmatpush3.msra.mxu1 %v142_v13 }
  0x16   :  { %305 = vmatprep.subr.mxu1 %v141_v14 }
  0x17   :  { %306 = vmatpush3.msra.mxu1 %v141_v14 }
  0x18   :  { %307 = vmatprep.subr.mxu1 %v140_v15 }
  0x19   :  { %308 = vmatpush3.msra.mxu1 %v140_v15 }
  0x1a   :  { %309 = vmatprep.subr.mxu1 %v139_v16 }
  0x1b   :  { %310 = vmatpush3.msra.mxu1 %v139_v16 }
  0x1c   :  { %311 = vmatprep.subr.mxu1 %v138_v17 }
  0x1d   :  { %312 = vmatpush3.msra.mxu1 %v138_v17 }
  0x1e   :  { %313 = vmatprep.subr.mxu1 %v137_v18 }
  0x1f   :  { %314 = vmatpush3.msra.mxu1 %v137_v18 }
  0x20   :  { %315 = vmatprep.subr.mxu1 %v136_v19 }
  0x21   :  { %316 = vmatpush3.msra.mxu1 %v136_v19 }
  0x22   :  { %317 = vmatprep.subr.mxu1 %v135_v20 }
  0x23   :  { %318 = vmatpush3.msra.mxu1 %v135_v20 }
  0x24   :  { %319 = vmatprep.subr.mxu1 %v134_v21 }
  0x25   :  { %320 = vmatpush3.msra.mxu1 %v134_v21 }
  0xca   :  { %v288_v23 = vpop.f32.mrf.mxu0 }
  0xcb   :  { %v113_v24 = vadd.f32 %v288_v23, %v250_v22 }
  0xcc   :  { %v107_v25 = vpop.f32.mrf.mxu0 }
  0xcd   :  { %v119_v26 = vmul.f32 0.044715, %v113_v24  ;;  %v108_v27 = vadd.f32 %v250_v22, %v107_v25  ;;  %v117_v42 = vmul.f32 0.5, %v113_v24 }
  0xcf   :  { %v121_v28 = vmul.f32 %v119_v26, %v113_v24  ;;  %v118_v29 = vmul.f32 0.044715, %v108_v27  ;;  %v116_v40 = vmul.f32 0.5, %v108_v27 }
  0xd1   :  { %v120_v30 = vmul.f32 %v118_v29, %v108_v27  ;;  %v123_v31 = vmul.f32 %v121_v28, %v113_v24 }
  0xd3   :  { %v122_v32 = vmul.f32 %v120_v30, %v108_v27  ;;  %v125_v33 = vadd.f32 %v123_v31, %v113_v24 }
  0xd5   :  { %v124_v34 = vadd.f32 %v122_v32, %v108_v27  ;;  %v127_v35 = vmul.f32 0.7978846, %v125_v33 }
  0xd7   :  { %v126_v36 = vmul.f32 0.7978846, %v124_v34  ;;  %327 = vtanh.f32 %v127_v35 }
  0xd9   :  { %329 = vtanh.f32 %v126_v36 }
  0xe4   :  { %v328_v37 = vpop.eup %327 }
  0xe5   :  { %v131_v39 = vadd.f32 1.0, %v328_v37 }
  0xe6   :  { %v330_v38 = vpop.eup %329 }
  0xe7   :  { %v130_v41 = vadd.f32 1.0, %v330_v38  ;;  %v133_v44 = vmul.f32 %v131_v39, %v117_v42 }
  0xe9   :  { %v132_v43 = vmul.f32 %v130_v41, %v116_v40 }
  0xeb   :  { %321 = vmatprep.mubr.f32.mxu1 %v132_v43 }
  0xec   :  { %322 = vmatmul.mubr.f32.vlgmr.msra.gmra.mxu1 %v133_v44 }
 0x1ac   :  { %v323_v46 = vpop.f32.mrf.mxu1 }
 0x1ad   :  { %v229_v47 = vadd.f32 %v323_v46, %v253_v45 }
 0x1ae   :  { %v223_v48 = vpop.f32.mrf.mxu1 }
 0x1af   :  { %233 = vst.msk [vmem:[#allocation2 + $0x8] sm:$0xff] %vm34_vm0, %v229_v47  ;;  %v224_v49 = vadd.f32 %v253_v45, %v223_v48 }
 0x1b1   :  { %232 = vst.msk [vmem:[#allocation2] sm:$0xff] %vm34_vm0, %v224_v49 }
 0x1b2   :  { %342 = shalt.err (!%p339_p4)
}
 0x1b3   :  { %s354_s13 = smov 128   ;;  %s355_s4 = smov 8  }
 0x1b4   :  { %245 = dma.vmem_to_hbm [thread:$0]  %s240_s11, 256, %s470_s5, [#allocation3], %s354_s13, %s354_s13, %s355_s4  }
 0x1b5   :  { %351 = dma.done.wait [#allocation3], 256  }
 0x1b6   :  { %352 = vsyncadd [#allocation3], 4294967040 }
 0x1b7   :  { %249 = vsyncpa [#allocation3], 1 }

</bundles_post_ra>
